<compile_context>
chip_gen: v7x
topology: tpu7x:2x2x1
jax: 0.10.0
libtpu: 0.0.40
codegen_flags: <defaults>
</compile_context>

<pallas_src>
import functools

import jax
import jax.numpy as jnp
from jax.experimental import pallas as pl
from jax.experimental.pallas import tpu as pltpu

EPS = 1e-5
DEFAULT_TILE_M = 512            # multiple of 16 for bf16 sublane packing; ~HBM-roofline tile
VMEM_LIMIT_BYTES = 48 * 1024 * 1024  # above v5e's 16 MiB scoped default, below v7x's 64 MiB


def _compiler_params(semantics):
    return pltpu.CompilerParams(dimension_semantics=semantics,
                                vmem_limit_bytes=VMEM_LIMIT_BYTES)


def _pad_rows(a, m_pad):
    m = a.shape[0]
    if m_pad == m:
        return a
    return jnp.pad(a, ((0, m_pad - m), (0, 0)))


# ---------------------------------------------------------------------------
# Kernel: per-channel sum / sum-of-squares partials (BN batch statistics)
# ---------------------------------------------------------------------------
def bn_stats_kernel(x_ref, sum_ref, sq_ref):
    x = x_ref[...].astype(jnp.float32)
    sum_ref[...] = jnp.sum(x, axis=0, keepdims=True)
    sq_ref[...] = jnp.sum(x * x, axis=0, keepdims=True)


def bn_batch_stats(x2d, tile_m=DEFAULT_TILE_M):
    """Per-channel (mean, biased var) over rows via an M-tiled Pallas reduction."""
    M, C = x2d.shape
    tile = int(min(tile_m, M))
    num_tiles = -(-M // tile)
    m_pad = num_tiles * tile
    x_p = _pad_rows(x2d, m_pad)  # zero rows contribute 0 to both partial sums

    s_p, q_p = pl.pallas_call(
        bn_stats_kernel,
        out_shape=(
            jax.ShapeDtypeStruct((num_tiles, C), jnp.float32),
            jax.ShapeDtypeStruct((num_tiles, C), jnp.float32),
        ),
        grid=(num_tiles,),
        in_specs=[pl.BlockSpec((tile, C), lambda i: (i, 0))],
        out_specs=(
            pl.BlockSpec((1, C), lambda i: (i, 0)),
            pl.BlockSpec((1, C), lambda i: (i, 0)),
        ),
        compiler_params=_compiler_params(("parallel",)),
    )(x_p)

    mean = jnp.sum(s_p, axis=0) / M
    var = jnp.sum(q_p, axis=0) / M - mean * mean
    return mean, var


# ---------------------------------------------------------------------------
# Kernel: fused (folded-BN affine + ReLU) -> matmul [-> +residual] [-> stat epilogue]
# Used for conv1 (1x1), the projection shortcut (1x1 strided) and conv3 (1x1 + residual).
# ---------------------------------------------------------------------------
def _fused_mm_kernel(*refs, with_residual, with_stats, need_mask, m_total, tile_m,
                     affine_dtype):
    idx = 0
    x_ref = refs[idx]; idx += 1
    s_ref = refs[idx]; idx += 1
    b_ref = refs[idx]; idx += 1
    w_ref = refs[idx]; idx += 1
    r_ref = None
    if with_residual:
        r_ref = refs[idx]; idx += 1
    o_ref = refs[idx]; idx += 1
    if with_stats:
        sum_ref = refs[idx]
        sq_ref = refs[idx + 1]

    # Folded-BN affine + ReLU in the MXU compute dtype (bf16 on v6e/v7x, f32 otherwise).
    x = x_ref[...].astype(affine_dtype)
    h = jnp.maximum(x * s_ref[...] + b_ref[...], 0.0)

    acc = jnp.dot(h, w_ref[...], preferred_element_type=jnp.float32)
    if with_residual:
        acc = acc + r_ref[...].astype(jnp.float32)

    o_ref[...] = acc.astype(o_ref.dtype)

    if with_stats:
        # Per-channel partial stats of the OUTPUT tile -> feeds the next BatchNorm without
        # re-reading the activation. Padded rows are masked here only (never on the matmul
        # input: out-of-range output rows are sliced off by the wrapper anyway).
        stats_src = acc
        if need_mask:
            row = jax.lax.broadcasted_iota(jnp.int32, (tile_m, 1), 0)
            valid = (row + pl.program_id(0) * tile_m) < m_total
            stats_src = jnp.where(valid, acc, 0.0)
        sum_ref[...] = jnp.sum(stats_src, axis=0, keepdims=True)
        sq_ref[...] = jnp.sum(stats_src * stats_src, axis=0, keepdims=True)


def fused_affine_relu_matmul(x2d, scale, bias, w, residual=None, want_stats=False,
                             out_dtype=jnp.float32, compute_dtype=jnp.bfloat16,
                             tile_m=DEFAULT_TILE_M):
    """relu(x*scale + bias) @ w [+ residual], M-tiled, optional output mean/var."""
    M, K = x2d.shape
    Kw, N = w.shape
    assert K == Kw, (K, Kw)

    tile = int(min(tile_m, M))
    num_tiles = -(-M // tile)
    m_pad = num_tiles * tile
    need_mask = m_pad != M

    x_p = _pad_rows(x2d, m_pad)
    scale2d = scale.reshape(1, K).astype(compute_dtype)
    bias2d = bias.reshape(1, K).astype(compute_dtype)
    w_c = w.astype(compute_dtype)

    in_specs = [
        pl.BlockSpec((tile, K), lambda i: (i, 0)),   # activation tile (streamed)
        pl.BlockSpec((1, K), lambda i: (0, 0)),      # scale (invariant)
        pl.BlockSpec((1, K), lambda i: (0, 0)),      # bias  (invariant)
        pl.BlockSpec((K, N), lambda i: (0, 0)),      # weights (invariant)
    ]
    args = [x_p, scale2d, bias2d, w_c]
    if residual is not None:
        in_specs.append(pl.BlockSpec((tile, N), lambda i: (i, 0)))
        args.append(_pad_rows(residual, m_pad))

    out_shapes = [jax.ShapeDtypeStruct((m_pad, N), out_dtype)]
    out_specs = [pl.BlockSpec((tile, N), lambda i: (i, 0))]
    if want_stats:
        out_shapes += [jax.ShapeDtypeStruct((num_tiles, N), jnp.float32)] * 2
        out_specs += [pl.BlockSpec((1, N), lambda i: (i, 0))] * 2

    kernel = functools.partial(
        _fused_mm_kernel,
        with_residual=residual is not None,
        with_stats=want_stats,
        need_mask=need_mask,
        m_total=M,
        tile_m=tile,
        affine_dtype=compute_dtype,
    )

    outs = pl.pallas_call(
        kernel,
        out_shape=tuple(out_shapes),
        grid=(num_tiles,),
        in_specs=in_specs,
        out_specs=tuple(out_specs),
        compiler_params=_compiler_params(("parallel",)),
    )(*args)

    o = outs[0][:M]
    if not want_stats:
        return o
    mean = jnp.sum(outs[1], axis=0) / M
    var = jnp.sum(outs[2], axis=0) / M - mean * mean
    return o, mean, var


# ---------------------------------------------------------------------------
# Kernel: elementwise folded-BN affine + ReLU (produces the conv2 input activation,
# which must be computed BEFORE spatial zero padding — that is the correctness fix).
# ---------------------------------------------------------------------------
def _affine_relu_kernel(x_ref, s_ref, b_ref, o_ref, *, affine_dtype):
    x = x_ref[...].astype(affine_dtype)
    o_ref[...] = jnp.maximum(x * s_ref[...] + b_ref[...], 0.0).astype(o_ref.dtype)


def affine_relu(x2d, scale, bias, out_dtype, tile_m=DEFAULT_TILE_M):
    M, C = x2d.shape
    tile = int(min(tile_m, M))
    num_tiles = -(-M // tile)
    m_pad = num_tiles * tile
    x_p = _pad_rows(x2d, m_pad)
    s2 = scale.reshape(1, C).astype(out_dtype)
    b2 = bias.reshape(1, C).astype(out_dtype)

    out = pl.pallas_call(
        functools.partial(_affine_relu_kernel, affine_dtype=out_dtype),
        out_shape=jax.ShapeDtypeStruct((m_pad, C), out_dtype),
        grid=(num_tiles,),
        in_specs=[pl.BlockSpec((tile, C), lambda i: (i, 0)),
                  pl.BlockSpec((1, C), lambda i: (0, 0)),
                  pl.BlockSpec((1, C), lambda i: (0, 0))],
        out_specs=pl.BlockSpec((tile, C), lambda i: (i, 0)),
        compiler_params=_compiler_params(("parallel",)),
    )(x_p, s2, b2)
    return out[:M]


# ---------------------------------------------------------------------------
# Kernel: 3x3 conv (padding=1, stride s) as 9 accumulating matmuls over a tap grid axis.
# Inputs: activated taps stacked (9, M_out, C); per-tap weights (9, C, planes);
# f32 VMEM accumulator; optional BN3-stat epilogue on the last tap.
# ---------------------------------------------------------------------------
def _conv2_kernel(*refs, with_stats, need_mask, m_total, tile_m, num_taps):
    x_ref = refs[0]          # (1, tile_m, C) activated tap tile
    w_ref = refs[1]          # (1, C, planes) tap weights
    o_ref = refs[2]
    if with_stats:
        sum_ref, sq_ref = refs[3], refs[4]
        acc_ref = refs[5]
    else:
        acc_ref = refs[3]

    t = pl.program_id(1)

    @pl.when(t == 0)
    def _():
        acc_ref[...] = jnp.zeros_like(acc_ref)

    acc_ref[...] += jnp.dot(x_ref[0], w_ref[0], preferred_element_type=jnp.float32)

    @pl.when(t == num_taps - 1)
    def _():
        acc = acc_ref[...]
        o_ref[...] = acc.astype(o_ref.dtype)
        if with_stats:
            stats_src = acc
            if need_mask:
                row = jax.lax.broadcasted_iota(jnp.int32, (tile_m, 1), 0)
                valid = (row + pl.program_id(0) * tile_m) < m_total
                stats_src = jnp.where(valid, acc, 0.0)
            sum_ref[...] = jnp.sum(stats_src, axis=0, keepdims=True)
            sq_ref[...] = jnp.sum(stats_src * stats_src, axis=0, keepdims=True)


def conv2_3x3(a_nhwc, w2_taps, stride, want_stats, out_dtype, compute_dtype,
              tile_m=DEFAULT_TILE_M):
    """3x3 conv (padding=1, stride) on the ALREADY-ACTIVATED NHWC tensor a_nhwc."""
    N, H, W, C = a_nhwc.shape
    P = w2_taps.shape[-1]
    Ho = (H + 2 - 3) // stride + 1
    Wo = (W + 2 - 3) // stride + 1
    M = N * Ho * Wo

    # Zero padding of the activated tensor (matches PyTorch: pad happens inside conv2,
    # after ReLU(BN2)). Tap views are plain-JAX layout plumbing (see TODO at top).
    padded = jnp.pad(a_nhwc, ((0, 0), (1, 1), (1, 1), (0, 0)))
    taps = []
    for ki in range(3):
        for kj in range(3):
            taps.append(
                padded[:, ki: ki + (Ho - 1) * stride + 1: stride,
                          kj: kj + (Wo - 1) * stride + 1: stride, :].reshape(M, C))
    tap_stack = jnp.stack(taps, axis=0).astype(compute_dtype)   # (9, M, C)

    tile = int(min(tile_m, M))
    num_tiles = -(-M // tile)
    m_pad = num_tiles * tile
    need_mask = m_pad != M
    if need_mask:
        tap_stack = jnp.pad(tap_stack, ((0, 0), (0, m_pad - M), (0, 0)))

    w_c = w2_taps.astype(compute_dtype)                          # (9, C, P)

    out_shapes = [jax.ShapeDtypeStruct((m_pad, P), out_dtype)]
    out_specs = [pl.BlockSpec((tile, P), lambda i, t: (i, 0))]
    if want_stats:
        out_shapes += [jax.ShapeDtypeStruct((num_tiles, P), jnp.float32)] * 2
        out_specs += [pl.BlockSpec((1, P), lambda i, t: (i, 0))] * 2

    kernel = functools.partial(
        _conv2_kernel, with_stats=want_stats, need_mask=need_mask,
        m_total=M, tile_m=tile, num_taps=9)

    outs = pl.pallas_call(
        kernel,
        out_shape=tuple(out_shapes),
        grid=(num_tiles, 9),                       # taps = reduction axis (last)
        in_specs=[pl.BlockSpec((1, tile, C), lambda i, t: (t, i, 0)),
                  pl.BlockSpec((1, C, P), lambda i, t: (t, 0, 0))],
        out_specs=tuple(out_specs),
        scratch_shapes=[pltpu.VMEM((tile, P), jnp.float32)],
        compiler_params=_compiler_params(("parallel", "arbitrary")),
    )(tap_stack, w_c)

    o = outs[0][:M]
    if not want_stats:
        return o, Ho, Wo
    mean = jnp.sum(outs[1], axis=0) / M
    var = jnp.sum(outs[2], axis=0) / M - mean * mean
    return o, Ho, Wo, mean, var


# ---------------------------------------------------------------------------
# PreActBottleneck forward (Pallas)
# ---------------------------------------------------------------------------
def preact_bottleneck_forward(x_nchw, params, stride, compute_dtype=jnp.bfloat16,
                              tile_m=DEFAULT_TILE_M):
    # NCHW -> NHWC, single cast to the compute dtype (the input is read three times:
    # BN1 stats, conv1 and the strided shortcut).
    x = jnp.transpose(x_nchw, (0, 2, 3, 1)).astype(compute_dtype)
    N, H, W, Cin = x.shape
    planes = params["w1"].shape[1]
    out_planes = params["w3"].shape[1]
    x2d = x.reshape(N * H * W, Cin)

    # BN1 batch stats (training mode, biased var) folded into per-channel scale/bias.
    mean1, var1 = bn_batch_stats(x2d, tile_m=tile_m)
    scale1 = params["gamma1"] / jnp.sqrt(var1 + EPS)
    bias1 = params["beta1"] - mean1 * scale1

    has_shortcut = (stride != 1) or (Cin != out_planes)

    # conv1 (1x1): fused BN1-affine + ReLU, matmul, BN2-stat epilogue.
    b2d, mean2, var2 = fused_affine_relu_matmul(
        x2d, scale1, bias1, params["w1"], want_stats=True,
        out_dtype=compute_dtype, compute_dtype=compute_dtype, tile_m=tile_m)

    # Shortcut: 1x1 strided conv on relu(bn1(x)); the cheap affine+relu is re-applied on
    # the strided raw input instead of materializing the activated tensor.
    if has_shortcut:
        xs = x[:, ::stride, ::stride, :]
        Ns, Hs, Ws, _ = xs.shape
        shortcut2d = fused_affine_relu_matmul(
            xs.reshape(Ns * Hs * Ws, Cin), scale1, bias1, params["ws"],
            want_stats=False, out_dtype=compute_dtype, compute_dtype=compute_dtype,
            tile_m=tile_m)
    else:
        shortcut2d = x2d  # identity residual, already in the compute dtype

    scale2 = params["gamma2"] / jnp.sqrt(var2 + EPS)
    bias2 = params["beta2"] - mean2 * scale2

    # BN2 affine + ReLU must happen BEFORE the conv2 zero-padding (correctness fix).
    a2d = affine_relu(b2d, scale2, bias2, out_dtype=compute_dtype, tile_m=tile_m)
    a = a2d.reshape(N, H, W, planes)

    # conv2 (3x3, stride, pad=1): 9 accumulating per-tap matmuls, BN3 stats in the epilogue.
    d2d, Ho, Wo, mean3, var3 = conv2_3x3(
        a, params["w2t"], stride, want_stats=True,
        out_dtype=compute_dtype, compute_dtype=compute_dtype, tile_m=tile_m)

    scale3 = params["gamma3"] / jnp.sqrt(var3 + EPS)
    bias3 = params["beta3"] - mean3 * scale3

    # conv3 (1x1): fused BN3-affine + ReLU, matmul, residual add.
    f2d = fused_affine_relu_matmul(
        d2d, scale3, bias3, params["w3"], residual=shortcut2d, want_stats=False,
        out_dtype=jnp.float32, compute_dtype=compute_dtype, tile_m=tile_m)

    out = f2d.reshape(N, Ho, Wo, out_planes)
    return jnp.transpose(out, (0, 3, 1, 2))  # NHWC -> NCHW


# ---------------------------------------------------------------------------
# Pure-JAX reference (mirrors the PyTorch module, training-mode BN, f32)
# ---------------------------------------------------------------------------
def reference_forward(x, p, stride, has_shortcut):
    def bn(v, gamma, beta):
        mean = v.mean(axis=(0, 2, 3), keepdims=True)
        var = v.var(axis=(0, 2, 3), keepdims=True)  # biased
        g = gamma.reshape(1, -1, 1, 1)
        b = beta.reshape(1, -1, 1, 1)
        return (v - mean) / jnp.sqrt(var + EPS) * g + b

    def conv(v, w, stride=1, padding=0):
        return jax.lax.conv_general_dilated(
            v, w, (stride, stride), ((padding, padding), (padding, padding)),
            dimension_numbers=("NCHW", "OIHW", "NCHW"),
        )

    out = jax.nn.relu(bn(x, p["gamma1"], p["beta1"]))
    shortcut = conv(out, p["ws_oihw"], stride=stride) if has_shortcut else x
    out = conv(out, p["w1_oihw"])
    out = conv(jax.nn.relu(bn(out, p["gamma2"], p["beta2"])), p["w2_oihw"],
               stride=stride, padding=1)
    out = conv(jax.nn.relu(bn(out, p["gamma3"], p["beta3"])), p["w3_oihw"])
    return out + shortcut


# ---------------------------------------------------------------------------
if __name__ == "__main__":
    in_planes, planes, stride = 4, 4, 2
    expansion = 4
    out_planes = expansion * planes

    key = jax.random.PRNGKey(0)
    ks = jax.random.split(key, 11)

    x = jax.random.normal(ks[0], (2, in_planes, 16, 16), dtype=jnp.float32)  # NCHW

    # Deterministic synthetic parameters (PyTorch OIHW conv layout, then matrixified).
    w1_oihw = 0.2 * jax.random.normal(ks[1], (planes, in_planes, 1, 1), dtype=jnp.float32)
    w2_oihw = 0.2 * jax.random.normal(ks[2], (planes, planes, 3, 3), dtype=jnp.float32)
    w3_oihw = 0.2 * jax.random.normal(ks[3], (out_planes, planes, 1, 1), dtype=jnp.float32)
    ws_oihw = 0.2 * jax.random.normal(ks[4], (out_planes, in_planes, 1, 1), dtype=jnp.float32)

    gamma1 = 1.0 + 0.1 * jax.random.normal(ks[5], (in_planes,), dtype=jnp.float32)
    beta1 = 0.1 * jax.random.normal(ks[6], (in_planes,), dtype=jnp.float32)
    gamma2 = 1.0 + 0.1 * jax.random.normal(ks[7], (planes,), dtype=jnp.float32)
    beta2 = 0.1 * jax.random.normal(ks[8], (planes,), dtype=jnp.float32)
    gamma3 = 1.0 + 0.1 * jax.random.normal(ks[9], (planes,), dtype=jnp.float32)
    beta3 = 0.1 * jax.random.normal(ks[10], (planes,), dtype=jnp.float32)

    params = {
        # matrix forms consumed by the Pallas path
        "w1": jnp.transpose(w1_oihw[:, :, 0, 0]),                                   # (Cin, planes)
        "w2t": jnp.transpose(w2_oihw, (2, 3, 1, 0)).reshape(9, planes, planes),     # (9, Cin, planes), tap=(ki,kj)
        "w3": jnp.transpose(w3_oihw[:, :, 0, 0]),                                   # (planes, 4*planes)
        "ws": jnp.transpose(ws_oihw[:, :, 0, 0]),                                   # (Cin, 4*planes)
        # original conv layouts (reference only)
        "w1_oihw": w1_oihw, "w2_oihw": w2_oihw, "w3_oihw": w3_oihw, "ws_oihw": ws_oihw,
        "gamma1": gamma1, "beta1": beta1,
        "gamma2": gamma2, "beta2": beta2,
        "gamma3": gamma3, "beta3": beta3,
    }

    has_shortcut = (stride != 1) or (in_planes != out_planes)
    ref = jax.block_until_ready(reference_forward(x, params, stride, has_shortcut))

    # 1) f32 path: parity with the PyTorch/JAX reference (same batch-stat BN, same conv).
    out_f32 = jax.block_until_ready(
        preact_bottleneck_forward(x, params, stride, compute_dtype=jnp.float32))
    assert out_f32.shape == ref.shape, (out_f32.shape, ref.shape)
    assert jnp.allclose(out_f32, ref, rtol=5e-3, atol=5e-3), float(
        jnp.max(jnp.abs(out_f32 - ref)))

    # 2) bf16 MXU path (default: halves HBM traffic, doubles MXU throughput):
    #    looser tolerance from bf16 activation rounding.
    out_bf16 = jax.block_until_ready(
        preact_bottleneck_forward(x, params, stride, compute_dtype=jnp.bfloat16))
    assert out_bf16.shape == ref.shape, (out_bf16.shape, ref.shape)
    assert jnp.allclose(out_bf16, ref, rtol=5e-2, atol=5e-2), float(
        jnp.max(jnp.abs(out_bf16 - ref)))

    print("KERNEL_OK")
</pallas_src>

<mosaic_0001>
module attributes {stable_mosaic.version = 11 : i64} {
  func.func @bn_stats_kernel(%arg0: i32, %arg1: memref<512x4xf32, #tpu.memory_space<vmem>>, %arg2: memref<1x4xf32, #tpu.memory_space<vmem>>, %arg3: memref<1x4xf32, #tpu.memory_space<vmem>>) attributes {dimension_semantics = [#tpu.dimension_semantics<parallel>], iteration_bounds = array<i64: 1>, scalar_prefetch = 0 : i64, scratch_operands = 0 : i64, tpu.core_type = #tpu.core_type<tc>, window_params = [{transform_indices = @transform_0, window_bounds = array<i64: 512, 4>}, {transform_indices = @transform_1, window_bounds = array<i64: 1, 4>}, {transform_indices = @transform_2, window_bounds = array<i64: 1, 4>}]} {
    %c0 = arith.constant 0 : index
    %c0_0 = arith.constant 0 : index
    %0 = vector.load %arg1[%c0, %c0_0] : memref<512x4xf32, #tpu.memory_space<vmem>>, vector<512x4xf32>
    %cst = arith.constant dense<0.000000e+00> : vector<4xf32>
    %1 = vector.multi_reduction <add>, %0, %cst [0] : vector<512x4xf32> to vector<4xf32>
    %2 = vector.shape_cast %1 : vector<4xf32> to vector<1x4xf32>
    %c0_1 = arith.constant 0 : index
    %c0_2 = arith.constant 0 : index
    %3 = vector.load %arg2[%c0_1, %c0_2] : memref<1x4xf32, #tpu.memory_space<vmem>>, vector<1x4xf32>
    tpu.vector_store %arg2[%c0_1, %c0_2], %2 {strides = array<i32>} : memref<1x4xf32, #tpu.memory_space<vmem>>, vector<1x4xf32>,
    %4 = arith.mulf %0, %0 : vector<512x4xf32>
    %cst_3 = arith.constant dense<0.000000e+00> : vector<4xf32>
    %5 = vector.multi_reduction <add>, %4, %cst_3 [0] : vector<512x4xf32> to vector<4xf32>
    %6 = vector.shape_cast %5 : vector<4xf32> to vector<1x4xf32>
    %c0_4 = arith.constant 0 : index
    %c0_5 = arith.constant 0 : index
    %7 = vector.load %arg3[%c0_4, %c0_5] : memref<1x4xf32, #tpu.memory_space<vmem>>, vector<1x4xf32>
    tpu.vector_store %arg3[%c0_4, %c0_5], %6 {strides = array<i32>} : memref<1x4xf32, #tpu.memory_space<vmem>>, vector<1x4xf32>,
    return
  }
  func.func @transform_0(%arg0: i32) -> (i32, i32) {
    %c0_i32 = arith.constant 0 : i32
    %c0_i32_0 = arith.constant 0 : i32
    return %arg0, %c0_i32 : i32, i32
  }
  func.func @transform_1(%arg0: i32) -> (i32, i32) {
    %c0_i32 = arith.constant 0 : i32
    %c0_i32_0 = arith.constant 0 : i32
    return %arg0, %c0_i32 : i32, i32
  }
  func.func @transform_2(%arg0: i32) -> (i32, i32) {
    %c0_i32 = arith.constant 0 : i32
    %c0_i32_0 = arith.constant 0 : i32
    return %arg0, %c0_i32 : i32, i32
  }
}

</mosaic_0001>

<bundles_post_ra>
// kernel: tpu_custom_call.1
= control target key start
LH: loop header
LB: loop body
LE: loop exit
PB: predicated region body
PF: predicated region fallthrough
CT: control target
= control target key end

     0   :  { %8 = vsyncpa [#allocation3], 0  ;;  %s1141_s0 = inlined_call_operand.vmem [shape: f32[512,4], index: 0, kind: input, shape index: {}]   ;;  %s1142_s1 = inlined_call_operand.hbm [shape: f32[1,4], index: 1, kind: output, shape index: {0}]   ;;  %s1143_s2 = inlined_call_operand.hbm [shape: f32[1,4], index: 2, kind: output, shape index: {1}]  }
   0x1   :  { %9 = vsyncpa [#allocation5], 0  ;;  %v12_v0 = vld [vmem:[%s1141_s0] sm:$0xff]  ;;  %v13_v1 = vld [vmem:[%s1141_s0 + $0x8] sm:$0xff]  ;;  %vm76_vm0 = vcmask 31744   ;;  %vm210_vm1 = vcmask 24576  }
   0x2   :  { %v14_v2 = vld [vmem:[%s1141_s0 + $0x10] sm:$0xff]  ;;  %v77_v3 = vsel %vm76_vm0, %v12_v0, 0.0  ;;  %v78_v4 = vsel %vm76_vm0, %v13_v1, 0.0  ;;  %v15_v5 = vld [vmem:[%s1141_s0 + $0x18] sm:$0xff]  ;;  %v16_v9 = vld [vmem:[%s1141_s0 + $0x20] sm:$0xff]  ;;  %v212_v54 = vmul.f32 %v12_v0, %v12_v0  ;;  %v213_v57 = vmul.f32 %v13_v1, %v13_v1 }
   0x3   :  { %v79_v6 = vadd.f32 %v78_v4, %v77_v3  ;;  %v80_v7 = vsel %vm76_vm0, %v14_v2, 0.0  ;;  %v82_v8 = vsel %vm76_vm0, %v15_v5, 0.0  ;;  %v84_v11 = vsel %vm76_vm0, %v16_v9, 0.0  ;;  %v17_v12 = vld [vmem:[%s1141_s0 + $0x28] sm:$0xff]  ;;  %v532_v15 = vld [vmem:[%s1141_s0 + $0x30] sm:$0xff]  ;;  %v539_v18 = vld [vmem:[%s1141_s0 + $0x38] sm:$0xff] }
   0x4   :  { %v86_v14 = vsel %vm76_vm0, %v17_v12, 0.0  ;;  %v88_v17 = vsel %vm76_vm0, %v532_v15, 0.0  ;;  %v90_v20 = vsel %vm76_vm0, %v539_v18, 0.0  ;;  %v546_v21 = vld [vmem:[%s1141_s0 + $0x40] sm:$0xff]  ;;  %v553_v24 = vld [vmem:[%s1141_s0 + $0x48] sm:$0xff]  ;;  %v560_v27 = vld [vmem:[%s1141_s0 + $0x50] sm:$0xff]  ;;  %v214_v58 = vmul.f32 %v14_v2, %v14_v2 }
   0x5   :  { %v81_v10 = vadd.f32 %v80_v7, %v79_v6  ;;  %v92_v23 = vsel %vm76_vm0, %v546_v21, 0.0  ;;  %v94_v26 = vsel %vm76_vm0, %v553_v24, 0.0  ;;  %v96_v29 = vsel %vm76_vm0, %v560_v27, 0.0  ;;  %v567_v30 = vld [vmem:[%s1141_s0 + $0x58] sm:$0xff]  ;;  %v574_v33 = vld [vmem:[%s1141_s0 + $0x60] sm:$0xff]  ;;  %v581_v36 = vld [vmem:[%s1141_s0 + $0x68] sm:$0xff] }
   0x6   :  { %v98_v32 = vsel %vm76_vm0, %v567_v30, 0.0  ;;  %v100_v35 = vsel %vm76_vm0, %v574_v33, 0.0  ;;  %v102_v38 = vsel %vm76_vm0, %v581_v36, 0.0  ;;  %v588_v39 = vld [vmem:[%s1141_s0 + $0x70] sm:$0xff]  ;;  %v595_v42 = vld [vmem:[%s1141_s0 + $0x78] sm:$0xff]  ;;  %v602_v45 = vld [vmem:[%s1141_s0 + $0x80] sm:$0xff]  ;;  %v215_v62 = vmul.f32 %v15_v5, %v15_v5 }
   0x7   :  { %v83_v13 = vadd.f32 %v82_v8, %v81_v10  ;;  %v104_v41 = vsel %vm76_vm0, %v588_v39, 0.0  ;;  %v106_v44 = vsel %vm76_vm0, %v595_v42, 0.0  ;;  %v108_v47 = vsel %vm76_vm0, %v602_v45, 0.0  ;;  %v609_v48 = vld [vmem:[%s1141_s0 + $0x88] sm:$0xff]  ;;  %v616_v51 = vld [vmem:[%s1141_s0 + $0x90] sm:$0xff]  ;;  %v623_v55 = vld [vmem:[%s1141_s0 + $0x98] sm:$0xff] }
   0x8   :  { %v110_v50 = vsel %vm76_vm0, %v609_v48, 0.0  ;;  %v112_v53 = vsel %vm76_vm0, %v616_v51, 0.0  ;;  %v114_v59 = vsel %vm76_vm0, %v623_v55, 0.0  ;;  %v630_v60 = vld [vmem:[%s1141_s0 + $0xa0] sm:$0xff]  ;;  %v276_v0 = vsel %vm76_vm0, %v212_v54, 0.0  ;;  %v638_v1 = vld [vmem:[%s1141_s0 + $0xa8] sm:$0xff] }
   0x9   :  { %v85_v16 = vadd.f32 %v84_v11, %v83_v13  ;;  %v116_v63 = vsel %vm76_vm0, %v630_v60, 0.0  ;;  %v216_v3 = vmul.f32 %v16_v9, %v16_v9  ;;  %v277_v4 = vsel %vm76_vm0, %v213_v57, 0.0  ;;  %v647_v8 = vld [vmem:[%s1141_s0 + $0xb0] sm:$0xff] }
   0xa   :  { %v279_v6 = vsel %vm76_vm0, %v214_v58, 0.0  ;;  %v118_v7 = vsel %vm76_vm0, %v638_v1, 0.0  ;;  %v278_v5 = vadd.f32 %v277_v4, %v276_v0  ;;  %v217_v11 = vmul.f32 %v17_v12, %v17_v12 }
   0xb   :  { %v87_v19 = vadd.f32 %v86_v14, %v85_v16  ;;  %v281_v13 = vsel %vm76_vm0, %v215_v62, 0.0  ;;  %v120_v9 = vsel %vm76_vm0, %v647_v8, 0.0  ;;  %v655_v16 = vld [vmem:[%s1141_s0 + $0xb8] sm:$0xff]  ;;  %v224_v62 = vmul.f32 %v574_v33, %v574_v33 }
   0xc   :  { %v280_v14 = vadd.f32 %v279_v6, %v278_v5  ;;  %v122_v12 = vsel %vm76_vm0, %v655_v16, 0.0  ;;  %v225_v4 = vmul.f32 %v581_v36, %v581_v36  ;;  %v735_v5 = vld [vmem:[%s1141_s0 + $0xf8] sm:$0xff] }
   0xd   :  { %v89_v22 = vadd.f32 %v88_v17, %v87_v19  ;;  %v218_v19 = vmul.f32 %v532_v15, %v532_v15  ;;  %v138_v36 = vsel %vm76_vm0, %v735_v5, 0.0 }
   0xf   :  { %v91_v25 = vadd.f32 %v90_v20, %v89_v22  ;;  %v283_v20 = vsel %vm76_vm0, %v216_v3, 0.0  ;;  %v282_v22 = vadd.f32 %v281_v13, %v280_v14  ;;  %v299_v13 = vsel %vm76_vm0, %v224_v62, 0.0  ;;  %v745_v14 = vld [vmem:[%s1141_s0 + $0x100] sm:$0xff] }
  0x10   :  { %v233_v62 = vmul.f32 %v638_v1, %v638_v1 }
  0x11   :  { %v93_v28 = vadd.f32 %v92_v23, %v91_v25  ;;  %v665_v23 = vld [vmem:[%s1141_s0 + $0xc0] sm:$0xff] }
  0x12   :  { %v124_v15 = vsel %vm76_vm0, %v665_v23, 0.0 }
  0x13   :  { %v95_v31 = vadd.f32 %v94_v26, %v93_v28  ;;  %v219_v26 = vmul.f32 %v539_v18, %v539_v18  ;;  %v285_v28 = vsel %vm76_vm0, %v217_v11, 0.0  ;;  %v226_v11 = vmul.f32 %v588_v39, %v588_v39 }
  0x14   :  { %v140_v39 = vsel %vm76_vm0, %v745_v14, 0.0 }
  0x15   :  { %v97_v34 = vadd.f32 %v96_v29, %v95_v31  ;;  %v284_v29 = vadd.f32 %v283_v20, %v282_v22  ;;  %v675_v31 = vld [vmem:[%s1141_s0 + $0xc8] sm:$0xff]  ;;  %v301_v20 = vsel %vm76_vm0, %v225_v4, 0.0  ;;  %v234_v4 = vmul.f32 %v647_v8, %v647_v8 }
  0x16   :  { %v126_v18 = vsel %vm76_vm0, %v675_v31, 0.0  ;;  %v755_v22 = vld [vmem:[%s1141_s0 + $0x108] sm:$0xff] }
  0x17   :  { %v99_v37 = vadd.f32 %v98_v32, %v97_v34  ;;  %v220_v34 = vmul.f32 %v546_v21, %v546_v21 }
  0x19   :  { %v101_v40 = vadd.f32 %v100_v35, %v99_v37  ;;  %v287_v35 = vsel %vm76_vm0, %v218_v19, 0.0  ;;  %v286_v37 = vadd.f32 %v285_v28, %v284_v29  ;;  %v227_v19 = vmul.f32 %v595_v42, %v595_v42  ;;  %v765_v29 = vld [vmem:[%s1141_s0 + $0x110] sm:$0xff] }
  0x1a   :  { %v303_v28 = vsel %vm76_vm0, %v226_v11, 0.0  ;;  %v142_v42 = vsel %vm76_vm0, %v755_v22, 0.0  ;;  %v235_v11 = vmul.f32 %v655_v16, %v655_v16 }
  0x1b   :  { %v103_v43 = vadd.f32 %v102_v38, %v101_v40  ;;  %v685_v38 = vld [vmem:[%s1141_s0 + $0xd0] sm:$0xff] }
  0x1c   :  { %v128_v21 = vsel %vm76_vm0, %v685_v38, 0.0 }
  0x1d   :  { %v105_v46 = vadd.f32 %v104_v41, %v103_v43  ;;  %v221_v41 = vmul.f32 %v553_v24, %v553_v24  ;;  %v289_v43 = vsel %vm76_vm0, %v219_v26, 0.0  ;;  %v228_v26 = vmul.f32 %v602_v45, %v602_v45 }
  0x1e   :  { %v144_v45 = vsel %vm76_vm0, %v765_v29, 0.0 }
  0x1f   :  { %v107_v49 = vadd.f32 %v106_v44, %v105_v46  ;;  %v288_v44 = vadd.f32 %v287_v35, %v286_v37  ;;  %v695_v46 = vld [vmem:[%s1141_s0 + $0xd8] sm:$0xff]  ;;  %v293_v57 = vsel %vm76_vm0, %v221_v41, 0.0  ;;  %v305_v35 = vsel %vm76_vm0, %v227_v19, 0.0 }
  0x20   :  { %v130_v24 = vsel %vm76_vm0, %v695_v46, 0.0  ;;  %v775_v37 = vld [vmem:[%s1141_s0 + $0x118] sm:$0xff]  ;;  %v230_v41 = vmul.f32 %v616_v51, %v616_v51  ;;  %v236_v19 = vmul.f32 %v665_v23, %v665_v23 }
  0x21   :  { %v109_v52 = vadd.f32 %v108_v47, %v107_v49  ;;  %v222_v49 = vmul.f32 %v560_v27, %v560_v27 }
  0x23   :  { %v111_v56 = vadd.f32 %v110_v50, %v109_v52  ;;  %v291_v50 = vsel %vm76_vm0, %v220_v34, 0.0  ;;  %v290_v52 = vadd.f32 %v289_v43, %v288_v44  ;;  %v229_v34 = vmul.f32 %v609_v48, %v609_v48  ;;  %v785_v44 = vld [vmem:[%s1141_s0 + $0x120] sm:$0xff] }
  0x24   :  { %v307_v43 = vsel %vm76_vm0, %v228_v26, 0.0  ;;  %v146_v48 = vsel %vm76_vm0, %v775_v37, 0.0  ;;  %v148_v51 = vsel %vm76_vm0, %v785_v44, 0.0  ;;  %v237_v26 = vmul.f32 %v675_v31, %v675_v31 }
  0x25   :  { %v113_v61 = vadd.f32 %v112_v53, %v111_v56  ;;  %v705_v53 = vld [vmem:[%s1141_s0 + $0xe0] sm:$0xff]  ;;  %v223_v56 = vmul.f32 %v567_v30, %v567_v30  ;;  %v292_v58 = vadd.f32 %v291_v50, %v290_v52  ;;  %v309_v50 = vsel %vm76_vm0, %v229_v34, 0.0  ;;  %v795_v52 = vld [vmem:[%s1141_s0 + $0x128] sm:$0xff] }
  0x26   :  { %v132_v27 = vsel %vm76_vm0, %v705_v53, 0.0  ;;  %v238_v34 = vmul.f32 %v685_v38, %v685_v38 }
  0x27   :  { %v115_v2 = vadd.f32 %v114_v59, %v113_v61  ;;  %v715_v59 = vld [vmem:[%s1141_s0 + $0xe8] sm:$0xff]  ;;  %v294_v0 = vadd.f32 %v293_v57, %v292_v58  ;;  %v297_v6 = vsel %vm76_vm0, %v223_v56, 0.0  ;;  %v232_v56 = vmul.f32 %v630_v60, %v630_v60  ;;  %v805_v58 = vld [vmem:[%s1141_s0 + $0x130] sm:$0xff] }
  0x28   :  { %v134_v30 = vsel %vm76_vm0, %v715_v59, 0.0  ;;  %v311_v57 = vsel %vm76_vm0, %v230_v41, 0.0  ;;  %v152_v60 = vsel %vm76_vm0, %v805_v58, 0.0  ;;  %v239_v41 = vmul.f32 %v695_v46, %v695_v46 }
  0x29   :  { %v117_v10 = vadd.f32 %v116_v63, %v115_v2  ;;  %v295_v63 = vsel %vm76_vm0, %v222_v49, 0.0  ;;  %v725_v2 = vld [vmem:[%s1141_s0 + $0xf0] sm:$0xff]  ;;  %v231_v49 = vmul.f32 %v623_v55, %v623_v55  ;;  %v150_v55 = vsel %vm76_vm0, %v795_v52, 0.0 }
  0x2a   :  { %v136_v33 = vsel %vm76_vm0, %v725_v2, 0.0 }
  0x2b   :  { %v119_v17 = vadd.f32 %v118_v7, %v117_v10  ;;  %v296_v7 = vadd.f32 %v295_v63, %v294_v0  ;;  %v313_v63 = vsel %vm76_vm0, %v231_v49, 0.0  ;;  %v815_v0 = vld [vmem:[%s1141_s0 + $0x138] sm:$0xff]  ;;  %v240_v49 = vmul.f32 %v705_v53, %v705_v53 }
  0x2c   :  { %v154_v1 = vsel %vm76_vm0, %v815_v0, 0.0 }
  0x2d   :  { %v121_v25 = vadd.f32 %v120_v9, %v119_v17  ;;  %v298_v9 = vadd.f32 %v297_v6, %v296_v7  ;;  %v315_v6 = vsel %vm76_vm0, %v232_v56, 0.0  ;;  %v825_v7 = vld [vmem:[%s1141_s0 + $0x140] sm:$0xff]  ;;  %v241_v56 = vmul.f32 %v715_v59, %v715_v59 }
  0x2e   :  { %v156_v8 = vsel %vm76_vm0, %v825_v7, 0.0 }
  0x2f   :  { %v123_v32 = vadd.f32 %v122_v12, %v121_v25  ;;  %v300_v12 = vadd.f32 %v299_v13, %v298_v9  ;;  %v317_v13 = vsel %vm76_vm0, %v233_v62, 0.0  ;;  %v835_v9 = vld [vmem:[%s1141_s0 + $0x148] sm:$0xff]  ;;  %v242_v62 = vmul.f32 %v725_v2, %v725_v2 }
  0x30   :  { %v158_v16 = vsel %vm76_vm0, %v835_v9, 0.0 }
  0x31   :  { %v125_v40 = vadd.f32 %v124_v15, %v123_v32  ;;  %v302_v15 = vadd.f32 %v301_v20, %v300_v12  ;;  %v319_v20 = vsel %vm76_vm0, %v234_v4, 0.0  ;;  %v845_v12 = vld [vmem:[%s1141_s0 + $0x150] sm:$0xff]  ;;  %v243_v4 = vmul.f32 %v735_v5, %v735_v5 }
  0x32   :  { %v160_v23 = vsel %vm76_vm0, %v845_v12, 0.0 }
  0x33   :  { %v127_v47 = vadd.f32 %v126_v18, %v125_v40  ;;  %v304_v18 = vadd.f32 %v303_v28, %v302_v15  ;;  %v321_v28 = vsel %vm76_vm0, %v235_v11, 0.0  ;;  %v855_v15 = vld [vmem:[%s1141_s0 + $0x158] sm:$0xff]  ;;  %v244_v11 = vmul.f32 %v745_v14, %v745_v14 }
  0x34   :  { %v162_v31 = vsel %vm76_vm0, %v855_v15, 0.0 }
  0x35   :  { %v129_v54 = vadd.f32 %v128_v21, %v127_v47  ;;  %v306_v21 = vadd.f32 %v305_v35, %v304_v18  ;;  %v323_v35 = vsel %vm76_vm0, %v236_v19, 0.0  ;;  %v865_v18 = vld [vmem:[%s1141_s0 + $0x160] sm:$0xff]  ;;  %v245_v19 = vmul.f32 %v755_v22, %v755_v22 }
  0x36   :  { %v164_v38 = vsel %vm76_vm0, %v865_v18, 0.0 }
  0x37   :  { %v131_v61 = vadd.f32 %v130_v24, %v129_v54  ;;  %v308_v24 = vadd.f32 %v307_v43, %v306_v21  ;;  %v325_v43 = vsel %vm76_vm0, %v237_v26, 0.0  ;;  %v875_v21 = vld [vmem:[%s1141_s0 + $0x168] sm:$0xff]  ;;  %v246_v26 = vmul.f32 %v765_v29, %v765_v29 }
  0x38   :  { %v166_v46 = vsel %vm76_vm0, %v875_v21, 0.0 }
  0x39   :  { %v133_v3 = vadd.f32 %v132_v27, %v131_v61  ;;  %v310_v27 = vadd.f32 %v309_v50, %v308_v24  ;;  %v327_v50 = vsel %vm76_vm0, %v238_v34, 0.0  ;;  %v885_v24 = vld [vmem:[%s1141_s0 + $0x170] sm:$0xff]  ;;  %v247_v34 = vmul.f32 %v775_v37, %v775_v37 }
  0x3a   :  { %v168_v53 = vsel %vm76_vm0, %v885_v24, 0.0 }
  0x3b   :  { %v135_v10 = vadd.f32 %v134_v30, %v133_v3  ;;  %v312_v30 = vadd.f32 %v311_v57, %v310_v27  ;;  %v329_v57 = vsel %vm76_vm0, %v239_v41, 0.0  ;;  %v895_v27 = vld [vmem:[%s1141_s0 + $0x178] sm:$0xff]  ;;  %v248_v41 = vmul.f32 %v785_v44, %v785_v44 }
  0x3c   :  { %v170_v59 = vsel %vm76_vm0, %v895_v27, 0.0 }
  0x3d   :  { %v137_v17 = vadd.f32 %v136_v33, %v135_v10  ;;  %v314_v33 = vadd.f32 %v313_v63, %v312_v30  ;;  %v331_v63 = vsel %vm76_vm0, %v240_v49, 0.0  ;;  %v905_v30 = vld [vmem:[%s1141_s0 + $0x180] sm:$0xff]  ;;  %v249_v49 = vmul.f32 %v795_v52, %v795_v52 }
  0x3e   :  { %v172_v2 = vsel %vm76_vm0, %v905_v30, 0.0 }
  0x3f   :  { %v139_v25 = vadd.f32 %v138_v36, %v137_v17  ;;  %v316_v36 = vadd.f32 %v315_v6, %v314_v33  ;;  %v333_v6 = vsel %vm76_vm0, %v241_v56, 0.0  ;;  %v915_v33 = vld [vmem:[%s1141_s0 + $0x188] sm:$0xff]  ;;  %v250_v56 = vmul.f32 %v805_v58, %v805_v58 }
  0x40   :  { %v174_v5 = vsel %vm76_vm0, %v915_v33, 0.0 }
  0x41   :  { %v141_v32 = vadd.f32 %v140_v39, %v139_v25  ;;  %v318_v39 = vadd.f32 %v317_v13, %v316_v36  ;;  %v335_v13 = vsel %vm76_vm0, %v242_v62, 0.0  ;;  %v925_v36 = vld [vmem:[%s1141_s0 + $0x190] sm:$0xff]  ;;  %v251_v62 = vmul.f32 %v815_v0, %v815_v0 }
  0x42   :  { %v176_v14 = vsel %vm76_vm0, %v925_v36, 0.0 }
  0x43   :  { %v143_v40 = vadd.f32 %v142_v42, %v141_v32  ;;  %v320_v42 = vadd.f32 %v319_v20, %v318_v39  ;;  %v337_v20 = vsel %vm76_vm0, %v243_v4, 0.0  ;;  %v935_v39 = vld [vmem:[%s1141_s0 + $0x198] sm:$0xff]  ;;  %v252_v4 = vmul.f32 %v825_v7, %v825_v7 }
  0x44   :  { %v178_v22 = vsel %vm76_vm0, %v935_v39, 0.0 }
  0x45   :  { %v145_v47 = vadd.f32 %v144_v45, %v143_v40  ;;  %v322_v45 = vadd.f32 %v321_v28, %v320_v42  ;;  %v339_v28 = vsel %vm76_vm0, %v244_v11, 0.0  ;;  %v945_v42 = vld [vmem:[%s1141_s0 + $0x1a0] sm:$0xff]  ;;  %v253_v11 = vmul.f32 %v835_v9, %v835_v9 }
  0x46   :  { %v180_v29 = vsel %vm76_vm0, %v945_v42, 0.0 }
  0x47   :  { %v147_v54 = vadd.f32 %v146_v48, %v145_v47  ;;  %v324_v48 = vadd.f32 %v323_v35, %v322_v45  ;;  %v341_v35 = vsel %vm76_vm0, %v245_v19, 0.0  ;;  %v955_v45 = vld [vmem:[%s1141_s0 + $0x1a8] sm:$0xff]  ;;  %v254_v19 = vmul.f32 %v845_v12, %v845_v12 }
  0x48   :  { %v182_v37 = vsel %vm76_vm0, %v955_v45, 0.0 }
  0x49   :  { %v149_v61 = vadd.f32 %v148_v51, %v147_v54  ;;  %v326_v51 = vadd.f32 %v325_v43, %v324_v48  ;;  %v343_v43 = vsel %vm76_vm0, %v246_v26, 0.0  ;;  %v965_v48 = vld [vmem:[%s1141_s0 + $0x1b0] sm:$0xff]  ;;  %v255_v26 = vmul.f32 %v855_v15, %v855_v15 }
  0x4a   :  { %v184_v44 = vsel %vm76_vm0, %v965_v48, 0.0 }
  0x4b   :  { %v151_v3 = vadd.f32 %v150_v55, %v149_v61  ;;  %v328_v55 = vadd.f32 %v327_v50, %v326_v51  ;;  %v345_v50 = vsel %vm76_vm0, %v247_v34, 0.0  ;;  %v975_v51 = vld [vmem:[%s1141_s0 + $0x1b8] sm:$0xff]  ;;  %v256_v34 = vmul.f32 %v865_v18, %v865_v18 }
  0x4c   :  { %v186_v52 = vsel %vm76_vm0, %v975_v51, 0.0 }
  0x4d   :  { %v153_v10 = vadd.f32 %v152_v60, %v151_v3  ;;  %v330_v60 = vadd.f32 %v329_v57, %v328_v55  ;;  %v347_v57 = vsel %vm76_vm0, %v248_v41, 0.0  ;;  %v985_v55 = vld [vmem:[%s1141_s0 + $0x1c0] sm:$0xff]  ;;  %v257_v41 = vmul.f32 %v875_v21, %v875_v21 }
  0x4e   :  { %v188_v58 = vsel %vm76_vm0, %v985_v55, 0.0 }
  0x4f   :  { %v155_v17 = vadd.f32 %v154_v1, %v153_v10  ;;  %v332_v1 = vadd.f32 %v331_v63, %v330_v60  ;;  %v349_v63 = vsel %vm76_vm0, %v249_v49, 0.0  ;;  %v995_v60 = vld [vmem:[%s1141_s0 + $0x1c8] sm:$0xff]  ;;  %v258_v49 = vmul.f32 %v885_v24, %v885_v24 }
  0x50   :  { %v190_v0 = vsel %vm76_vm0, %v995_v60, 0.0 }
  0x51   :  { %v157_v25 = vadd.f32 %v156_v8, %v155_v17  ;;  %v334_v8 = vadd.f32 %v333_v6, %v332_v1  ;;  %v351_v6 = vsel %vm76_vm0, %v250_v56, 0.0  ;;  %v1005_v1 = vld [vmem:[%s1141_s0 + $0x1d0] sm:$0xff]  ;;  %v365_v56 = vsel %vm76_vm0, %v257_v41, 0.0 }
  0x52   :  { %v192_v7 = vsel %vm76_vm0, %v1005_v1, 0.0 }
  0x53   :  { %v159_v32 = vadd.f32 %v158_v16, %v157_v25  ;;  %v336_v16 = vadd.f32 %v335_v13, %v334_v8  ;;  %v353_v13 = vsel %vm76_vm0, %v251_v62, 0.0  ;;  %v1015_v8 = vld [vmem:[%s1141_s0 + $0x1d8] sm:$0xff] }
  0x54   :  { %v194_v9 = vsel %vm76_vm0, %v1015_v8, 0.0 }
  0x55   :  { %v161_v40 = vadd.f32 %v160_v23, %v159_v32  ;;  %v338_v23 = vadd.f32 %v337_v20, %v336_v16  ;;  %v355_v20 = vsel %vm76_vm0, %v252_v4, 0.0  ;;  %v1025_v16 = vld [vmem:[%s1141_s0 + $0x1e0] sm:$0xff] }
  0x56   :  { %v196_v12 = vsel %vm76_vm0, %v1025_v16, 0.0 }
  0x57   :  { %v163_v47 = vadd.f32 %v162_v31, %v161_v40  ;;  %v340_v31 = vadd.f32 %v339_v28, %v338_v23  ;;  %v357_v28 = vsel %vm76_vm0, %v253_v11, 0.0  ;;  %v1035_v23 = vld [vmem:[%s1141_s0 + $0x1e8] sm:$0xff] }
  0x58   :  { %v198_v15 = vsel %vm76_vm0, %v1035_v23, 0.0 }
  0x59   :  { %v165_v54 = vadd.f32 %v164_v38, %v163_v47  ;;  %v342_v38 = vadd.f32 %v341_v35, %v340_v31  ;;  %v359_v35 = vsel %vm76_vm0, %v254_v19, 0.0  ;;  %v1045_v31 = vld [vmem:[%s1141_s0 + $0x1f0] sm:$0xff] }
  0x5a   :  { %v200_v18 = vsel %vm76_vm0, %v1045_v31, 0.0 }
  0x5b   :  { %v167_v61 = vadd.f32 %v166_v46, %v165_v54  ;;  %v344_v46 = vadd.f32 %v343_v43, %v342_v38  ;;  %v361_v43 = vsel %vm76_vm0, %v255_v26, 0.0  ;;  %v1055_v38 = vld [vmem:[%s1141_s0 + $0x1f8] sm:$0xff]  ;;  %s488_s0 = smov [#allocation2]  }
  0x5c   :  { %v202_v21 = vsel %vm76_vm0, %v1055_v38, 0.0  ;;  %s416_s25 = sshll.u32 %s488_s0, 4  ;;  %s417_s25 = int_to_ptr.vmem [resolvable:$true] %s416_s25 }
  0x5d   :  { %v169_v3 = vadd.f32 %v168_v53, %v167_v61  ;;  %v346_v53 = vadd.f32 %v345_v50, %v344_v46  ;;  %v363_v50 = vsel %vm76_vm0, %v256_v34, 0.0  ;;  %s440_s26 = scalar_lea.vmem %s417_s25, 16  ;;  %s444_s27 = scalar_lea.vmem %s417_s25, 32 }
  0x5e   :  { %p441_p0 = scmp.ne.s32.totalorder %s417_s25, %s440_s26  ;;  %p445_p1 = scmp.lt.s32.totalorder %s417_s25, %s417_s25 }
  0x5f   :  { %v171_v10 = vadd.f32 %v170_v59, %v169_v3  ;;  %v348_v59 = vadd.f32 %v347_v57, %v346_v53  ;;  %v260_v53 = vmul.f32 %v905_v30, %v905_v30  ;;  %v263_v30 = vmul.f32 %v935_v39, %v935_v39  ;;  %p446_p2 = scmp.lt.s32.totalorder %s444_s27, %s440_s26 }
  0x61   :  { %v173_v17 = vadd.f32 %v172_v2, %v171_v10  ;;  %v350_v2 = vadd.f32 %v349_v63, %v348_v59  ;;  %v261_v63 = vmul.f32 %v915_v33, %v915_v33  ;;  %v371_v4 = vsel %vm76_vm0, %v260_v53, 0.0  ;;  %p447_p3 = por %p446_p2, %p445_p1 }
  0x62   :  { %v264_v33 = vmul.f32 %v945_v42, %v945_v42 }
  0x63   :  { %v175_v25 = vadd.f32 %v174_v5, %v173_v17  ;;  %v352_v5 = vadd.f32 %v351_v6, %v350_v2  ;;  %v373_v2 = vsel %vm76_vm0, %v261_v63, 0.0  ;;  %p448_p4 = pnand %p447_p3, %p441_p0 }
  0x65   :  { %v177_v32 = vadd.f32 %v176_v14, %v175_v25  ;;  %v354_v14 = vadd.f32 %v353_v13, %v352_v5  ;;  %v265_v5 = vmul.f32 %v955_v45, %v955_v45 }
  0x67   :  { %v179_v40 = vadd.f32 %v178_v22, %v177_v32  ;;  %v356_v22 = vadd.f32 %v355_v20, %v354_v14  ;;  %v266_v20 = vmul.f32 %v965_v48, %v965_v48  ;;  %v267_v14 = vmul.f32 %v975_v51, %v975_v51 }
  0x69   :  { %v181_v47 = vadd.f32 %v180_v29, %v179_v40  ;;  %v358_v29 = vadd.f32 %v357_v28, %v356_v22 }
  0x6b   :  { %v183_v54 = vadd.f32 %v182_v37, %v181_v47  ;;  %v360_v37 = vadd.f32 %v359_v35, %v358_v29 }
  0x6d   :  { %v185_v61 = vadd.f32 %v184_v44, %v183_v54  ;;  %v362_v44 = vadd.f32 %v361_v43, %v360_v37  ;;  %v259_v54 = vmul.f32 %v895_v27, %v895_v27  ;;  %v262_v27 = vmul.f32 %v925_v36, %v925_v36 }
  0x6f   :  { %v187_v3 = vadd.f32 %v186_v52, %v185_v61  ;;  %v364_v57 = vadd.f32 %v363_v50, %v362_v44  ;;  %v367_v61 = vsel %vm76_vm0, %v258_v49, 0.0  ;;  %v375_v13 = vsel %vm76_vm0, %v262_v27, 0.0 }
  0x71   :  { %v189_v10 = vadd.f32 %v188_v58, %v187_v3  ;;  %v366_v24 = vadd.f32 %v365_v56, %v364_v57  ;;  %v369_v58 = vsel %vm76_vm0, %v259_v54, 0.0 }
  0x73   :  { %v191_v17 = vadd.f32 %v190_v0, %v189_v10  ;;  %v368_v59 = vadd.f32 %v367_v61, %v366_v24 }
  0x75   :  { %v193_v25 = vadd.f32 %v192_v7, %v191_v17  ;;  %v370_v6 = vadd.f32 %v369_v58, %v368_v59  ;;  %v377_v17 = vsel %vm76_vm0, %v263_v30, 0.0 }
  0x77   :  { %v195_v32 = vadd.f32 %v194_v9, %v193_v25  ;;  %v372_v10 = vadd.f32 %v371_v4, %v370_v6  ;;  %v379_v9 = vsel %vm76_vm0, %v264_v33, 0.0  ;;  %v381_v25 = vsel %vm76_vm0, %v265_v5, 0.0 }
  0x79   :  { %v197_v40 = vadd.f32 %v196_v12, %v195_v32  ;;  %v374_v7 = vadd.f32 %v373_v2, %v372_v10 }
  0x7b   :  { %v199_v47 = vadd.f32 %v198_v15, %v197_v40  ;;  %v376_v39 = vadd.f32 %v375_v13, %v374_v7 }
  0x7d   :  { %v201_v46 = vadd.f32 %v200_v18, %v199_v47  ;;  %v378_v42 = vadd.f32 %v377_v17, %v376_v39 }
  0x7f   :  { %v203_v52 = vadd.f32 %v202_v21, %v201_v46  ;;  %v380_v45 = vadd.f32 %v379_v9, %v378_v42 }
  0x81   :  { %v204_v62 = vrot.slane %v203_v52, 4 }
  0x83   :  { %v205_v3 = vadd.f32 %v204_v62, %v203_v52 }
  0x85   :  { %v206_v0 = vrot.slane %v205_v3, 2 }
  0x87   :  { %v207_v11 = vadd.f32 %v206_v0, %v205_v3 }
  0x89   :  { %v208_v36 = vrot.slane %v207_v11, 1 }
  0x8b   :  { %v209_v19 = vadd.f32 %v208_v36, %v207_v11 }
  0x8d   :  { %211 = vst.msk [vmem:[#allocation2] sm:$0x1] %vm210_vm1, %v209_v19 }
  0x8e   :  { %451 = shalt.err (!%p448_p4)
}
  0x8f   :  { %s452_s30 = scalar_lea.hbm %s1142_s1, 16 }
  0x90   :  { %p453_p5 = scmp.ne.s32.totalorder %s1142_s1, %s452_s30  ;;  %p456_p6 = scmp.lt.u32.totalorder %s452_s30, %s1142_s1 }
  0x92   :  { %p458_p7 = pnand %p456_p6, %p453_p5 }
  0x94   :  { %461 = shalt.err (!%p458_p7)
}
  0x95   :  { %419 = dma.vmem_to_hbm [thread:$0]  %s417_s25, 16, %s1142_s1, [#allocation3]   ;;  %v268_v48 = vmul.f32 %v985_v55, %v985_v55  ;;  %v383_v51 = vsel %vm76_vm0, %v266_v20, 0.0  ;;  %v382_v26 = vadd.f32 %v381_v25, %v380_v45  ;;  %v269_v28 = vmul.f32 %v995_v60, %v995_v60 }
  0x96   :  { %v385_v12 = vsel %vm76_vm0, %v267_v14, 0.0  ;;  %v270_v32 = vmul.f32 %v1005_v1, %v1005_v1  ;;  %v271_v15 = vmul.f32 %v1015_v8, %v1015_v8  ;;  %v272_v40 = vmul.f32 %v1025_v16, %v1025_v16  ;;  %s489_s1 = smov [#allocation4]  }
  0x97   :  { %v384_v22 = vadd.f32 %v383_v51, %v382_v26  ;;  %v387_v34 = vsel %vm76_vm0, %v268_v48, 0.0  ;;  %v389_v55 = vsel %vm76_vm0, %v269_v28, 0.0  ;;  %v273_v43 = vmul.f32 %v1035_v23, %v1035_v23  ;;  %s426_s9 = sshll.u32 %s489_s1, 4  ;;  %s427_s9 = int_to_ptr.vmem [resolvable:$true] %s426_s9 }
  0x98   :  { %v391_v60 = vsel %vm76_vm0, %v270_v32, 0.0  ;;  %v393_v1 = vsel %vm76_vm0, %v271_v15, 0.0  ;;  %v274_v37 = vmul.f32 %v1045_v31, %v1045_v31  ;;  %v395_v8 = vsel %vm76_vm0, %v272_v40, 0.0  ;;  %s462_s10 = scalar_lea.vmem %s427_s9, 16  ;;  %s466_s11 = scalar_lea.vmem %s427_s9, 32 }
  0x99   :  { %v386_v35 = vadd.f32 %v385_v12, %v384_v22  ;;  %v275_v49 = vmul.f32 %v1055_v38, %v1055_v38  ;;  %v397_v16 = vsel %vm76_vm0, %v273_v43, 0.0  ;;  %p463_p8 = scmp.ne.s32.totalorder %s427_s9, %s462_s10  ;;  %p467_p9 = scmp.lt.s32.totalorder %s427_s9, %s427_s9 }
  0x9a   :  { %v399_v21 = vsel %vm76_vm0, %v274_v37, 0.0  ;;  %p468_p10 = scmp.lt.s32.totalorder %s466_s11, %s462_s10 }
  0x9b   :  { %v388_v29 = vadd.f32 %v387_v34, %v386_v35  ;;  %v401_v23 = vsel %vm76_vm0, %v275_v49, 0.0 }
  0x9c   :  { %p469_p11 = por %p468_p10, %p467_p9 }
  0x9d   :  { %v390_v41 = vadd.f32 %v389_v55, %v388_v29 }
  0x9e   :  { %p470_p12 = pnand %p469_p11, %p463_p8 }
  0x9f   :  { %v392_v18 = vadd.f32 %v391_v60, %v390_v41 }
  0xa1   :  { %v394_v47 = vadd.f32 %v393_v1, %v392_v18 }
  0xa3   :  { %v396_v50 = vadd.f32 %v395_v8, %v394_v47 }
  0xa5   :  { %v398_v44 = vadd.f32 %v397_v16, %v396_v50 }
  0xa7   :  { %v400_v46 = vadd.f32 %v399_v21, %v398_v44 }
  0xa9   :  { %v402_v54 = vadd.f32 %v401_v23, %v400_v46 }
  0xab   :  { %v403_v56 = vrot.slane %v402_v54, 4 }
  0xad   :  { %v404_v57 = vadd.f32 %v403_v56, %v402_v54 }
  0xaf   :  { %v405_v52 = vrot.slane %v404_v57, 2 }
  0xb1   :  { %v406_v31 = vadd.f32 %v405_v52, %v404_v57 }
  0xb3   :  { %v407_v53 = vrot.slane %v406_v31, 1 }
  0xb5   :  { %v408_v61 = vadd.f32 %v407_v53, %v406_v31 }
  0xb7   :  { %409 = vst.msk [vmem:[#allocation4] sm:$0x1] %vm210_vm1, %v408_v61 }
  0xb8   :  { %473 = shalt.err (!%p470_p12)
}
  0xb9   :  { %s474_s14 = scalar_lea.hbm %s1143_s2, 16 }
  0xba   :  { %p475_p13 = scmp.ne.s32.totalorder %s1143_s2, %s474_s14  ;;  %p478_p0 = scmp.lt.u32.totalorder %s474_s14, %s1143_s2 }
  0xbc   :  { %p480_p1 = pnand %p478_p0, %p475_p13 }
  0xbe   :  { %483 = shalt.err (!%p480_p1)
}
  0xbf   :  { %429 = dma.vmem_to_hbm [thread:$0]  %s427_s9, 16, %s1143_s2, [#allocation5]  }
  0xc0   :  { %484 = dma.done.wait [#allocation3], 16  }
  0xc1   :  { %485 = vsyncadd [#allocation3], 4294967280 }
  0xc2   :  { %486 = dma.done.wait [#allocation5], 16  }
  0xc3   :  { %487 = vsyncadd [#allocation5], 4294967280 }
  0xc4   :  { %436 = vsyncpa [#allocation3], 1 }
  0xc5   :  { %437 = vsyncpa [#allocation5], 1 }

</bundles_post_ra>
